<compile_context>
chip_gen: v5e
topology: v5e:2x2
jax: 0.10.0
libtpu: 0.0.40
codegen_flags: <defaults>
</compile_context>

<pallas_src>
import random

import jax
import jax.numpy as jnp
from jax.experimental import pallas as pl
from jax.experimental.pallas import tpu as pltpu

EMBED_DIM = 200   # module hardcodes embed_dim = 200
HIDDEN_DIM = 150  # module hardcodes hidden_dim = 150 (use_birnn = False)


# ----------------------------- encoder kernel -------------------------------

def _enc_gru_kernel(gi_ref, whh_ref, bhh_ref, out_ref, h_scr):
    """One encoder GRU step (grid over source time).

    gi:(1,3,B,H) precomputed x@W_ih+b_ih (gate on leading dim), whh:(3,H,H), bhh:(3,1,H)
    out:(1,B,H) encoder output for this step, h_scr:(B,H) VMEM recurrent carry.
    """
    t = pl.program_id(0)

    @pl.when(t == 0)
    def _():
        h_scr[...] = jnp.zeros_like(h_scr)

    h = h_scr[...]
    gi = gi_ref[0]                                      # (3, B, H) — gate slices are leading-dim views
    gh_r = jnp.dot(h, whh_ref[0], preferred_element_type=jnp.float32) + bhh_ref[0]
    gh_z = jnp.dot(h, whh_ref[1], preferred_element_type=jnp.float32) + bhh_ref[1]
    gh_n = jnp.dot(h, whh_ref[2], preferred_element_type=jnp.float32) + bhh_ref[2]
    r = jax.nn.sigmoid(gi[0] + gh_r)
    z = jax.nn.sigmoid(gi[1] + gh_z)
    n = jnp.tanh(gi[2] + r * gh_n)
    h_new = (1.0 - z) * n + z * h
    h_scr[...] = h_new
    out_ref[0] = h_new


def encoder_forward(gi_all, whh, bhh):
    """gi_all:(S,3,B,H) -> enc_outs:(S,B,H). Single pallas_call, weights stay VMEM-resident."""
    S, _, B, H = gi_all.shape
    grid_spec = pltpu.PrefetchScalarGridSpec(
        num_scalar_prefetch=0,
        grid=(S,),
        in_specs=[
            pl.BlockSpec((1, 3, B, H), lambda t: (t, 0, 0, 0)),
            pl.BlockSpec((3, H, H), lambda t: (0, 0, 0)),     # resident across all steps
            pl.BlockSpec((3, 1, H), lambda t: (0, 0, 0)),     # resident
        ],
        out_specs=pl.BlockSpec((1, B, H), lambda t: (t, 0, 0)),
        scratch_shapes=[pltpu.VMEM((B, H), jnp.float32)],
    )
    return pl.pallas_call(
        _enc_gru_kernel,
        out_shape=jax.ShapeDtypeStruct((S, B, H), jnp.float32),
        grid_spec=grid_spec,
        compiler_params=pltpu.CompilerParams(dimension_semantics=("arbitrary",)),
    )(gi_all, whh, bhh)


# ----------------------------- decoder kernel -------------------------------

def _dec_step_kernel(tf_ref, inp_emb_ref, h0_ref, enc_ref, emb_ref,
                     wih_ref, whh_ref, bih_ref, bhh_ref,
                     wwd_ref, wwc_ref, bw_ref, wp_ref, bp_ref,
                     pred_out_ref, h_scr, prev_scr):
    """One decoder step: input select (TF vs greedy) + GRU + dot attention + output head.

    tf_ref:(T,) SMEM flags; inp_emb:(1,B,E) teacher-forced input embedding for this step;
    h0:(B,H) encoder final hidden; enc:(B,S,H); emb:(Vp,E) padded decoder embedding table;
    wih/whh:(3,*,H), bih/bhh:(3,1,H); wwd/wwc:(H,H); bw:(1,H); wp:(H,Vp); bp:(1,Vp).
    pred_out:(1,B,Vp); scratch: h_scr:(B,H) hidden carry, prev_scr:(B,Vp) previous logits.
    """
    i = pl.program_id(0)
    B, H = h_scr.shape
    Vp = prev_scr.shape[1]

    @pl.when(i == 0)
    def _():
        h_scr[...] = h0_ref[...]
        prev_scr[...] = jnp.zeros_like(prev_scr)

    # ---- input embedding: teacher forcing vs greedy argmax of previous prediction ----
    tf_f = tf_ref[i].astype(jnp.float32)                         # scalar 0./1.
    emb_tf = inp_emb_ref[0]                                      # (B, E)
    prev = prev_scr[...]                                         # (B, Vp)
    mx = jnp.max(prev, axis=-1, keepdims=True)                   # (B, 1)
    lane = jax.lax.broadcasted_iota(jnp.float32, (B, Vp), 1)
    idx = jnp.min(jnp.where(prev == mx, lane, float(Vp)),
                  axis=-1, keepdims=True)                        # first argmax index (as f32)
    onehot = (lane == idx).astype(jnp.float32)                   # (B, Vp)
    emb_greedy = jnp.dot(onehot, emb_ref[...],
                         preferred_element_type=jnp.float32)     # (B, E) embedding lookup on MXU
    emb = tf_f * emb_tf + (1.0 - tf_f) * emb_greedy

    # ---- GRU step (PyTorch gate order r,z,n; per-gate matmuls keep lanes aligned) ----
    h = h_scr[...]
    gi_r = jnp.dot(emb, wih_ref[0], preferred_element_type=jnp.float32) + bih_ref[0]
    gi_z = jnp.dot(emb, wih_ref[1], preferred_element_type=jnp.float32) + bih_ref[1]
    gi_n = jnp.dot(emb, wih_ref[2], preferred_element_type=jnp.float32) + bih_ref[2]
    gh_r = jnp.dot(h, whh_ref[0], preferred_element_type=jnp.float32) + bhh_ref[0]
    gh_z = jnp.dot(h, whh_ref[1], preferred_element_type=jnp.float32) + bhh_ref[1]
    gh_n = jnp.dot(h, whh_ref[2], preferred_element_type=jnp.float32) + bhh_ref[2]
    r = jax.nn.sigmoid(gi_r + gh_r)
    z = jax.nn.sigmoid(gi_z + gh_z)
    n = jnp.tanh(gi_n + r * gh_n)
    h_new = (1.0 - z) * n + z * h
    h_scr[...] = h_new

    # ---- dot attention over encoder outputs ----
    enc = enc_ref[...]                                           # (B, S, H)
    energy = jnp.sum(enc * h_new[:, None, :], axis=-1)           # (B, S)
    energy = energy - jnp.max(energy, axis=-1, keepdims=True)
    p = jnp.exp(energy)
    attn = p * pl.reciprocal(jnp.sum(p, axis=-1, keepdims=True), approx=True)
    context = jnp.sum(attn[:, :, None] * enc, axis=1)            # (B, H)

    # ---- concat-linear (split halves) + tanh + prediction linear (Vp lane-dense) ----
    wo = (jnp.dot(h_new, wwd_ref[...], preferred_element_type=jnp.float32)
          + jnp.dot(context, wwc_ref[...], preferred_element_type=jnp.float32)
          + bw_ref[...])
    out = jnp.tanh(wo)
    pred = jnp.dot(out, wp_ref[...], preferred_element_type=jnp.float32) + bp_ref[...]  # (B, Vp)

    prev_scr[...] = pred
    pred_out_ref[0] = pred


def decoder_forward(tf_flags, inp_embs, h0, enc_outs, emb_tbl, params):
    T, B, E = inp_embs.shape
    _, S, H = enc_outs.shape
    Vp = params["w_p_t"].shape[1]

    grid_spec = pltpu.PrefetchScalarGridSpec(
        num_scalar_prefetch=1,            # tf_flags -> SMEM
        grid=(T,),
        in_specs=[
            pl.BlockSpec((1, B, E), lambda i, tf: (i, 0, 0)),     # per-step TF input embedding
            pl.BlockSpec((B, H), lambda i, tf: (0, 0)),           # h0 (resident)
            pl.BlockSpec((B, S, H), lambda i, tf: (0, 0, 0)),     # enc_outs (resident)
            pl.BlockSpec((Vp, E), lambda i, tf: (0, 0)),          # padded embedding table
            pl.BlockSpec((3, E, H), lambda i, tf: (0, 0, 0)),     # dec W_ih
            pl.BlockSpec((3, H, H), lambda i, tf: (0, 0, 0)),     # dec W_hh
            pl.BlockSpec((3, 1, H), lambda i, tf: (0, 0, 0)),     # dec b_ih
            pl.BlockSpec((3, 1, H), lambda i, tf: (0, 0, 0)),     # dec b_hh
            pl.BlockSpec((H, H), lambda i, tf: (0, 0)),           # w (dec half)
            pl.BlockSpec((H, H), lambda i, tf: (0, 0)),           # w (ctx half)
            pl.BlockSpec((1, H), lambda i, tf: (0, 0)),           # b_w
            pl.BlockSpec((H, Vp), lambda i, tf: (0, 0)),          # prediction weight (padded)
            pl.BlockSpec((1, Vp), lambda i, tf: (0, 0)),          # prediction bias (padded)
        ],
        out_specs=pl.BlockSpec((1, B, Vp), lambda i, tf: (i, 0, 0)),
        scratch_shapes=[pltpu.VMEM((B, H), jnp.float32),
                        pltpu.VMEM((B, Vp), jnp.float32)],
    )
    return pl.pallas_call(
        _dec_step_kernel,
        out_shape=jax.ShapeDtypeStruct((T, B, Vp), jnp.float32),
        grid_spec=grid_spec,
        compiler_params=pltpu.CompilerParams(dimension_semantics=("arbitrary",)),
    )(tf_flags, inp_embs, h0, enc_outs, emb_tbl,
      params["dec_wih"], params["dec_whh"], params["dec_bih"], params["dec_bhh"],
      params["ww_dec"], params["ww_ctx"], params["b_w"],
      params["w_p_t"], params["b_p"])


# ------------------------------ plain-JAX glue -------------------------------

def init_params(key, src_vocab, tgt_vocab, embed_dim=EMBED_DIM, hidden_dim=HIDDEN_DIM):
    ks = jax.random.split(key, 16)
    s = 1.0 / jnp.sqrt(hidden_dim)
    s2 = 1.0 / jnp.sqrt(2 * hidden_dim)
    Vp = ((tgt_vocab + 127) // 128) * 128   # pad vocab to a 128-lane multiple

    def u(k, shape, scale):
        return jax.random.uniform(k, shape, jnp.float32, -scale, scale)

    w_p = u(ks[13], (hidden_dim, tgt_vocab), s)
    b_p = u(ks[14], (1, tgt_vocab), s)

    p = {
        # encoder
        "enc_embed": jax.random.normal(ks[0], (src_vocab, embed_dim), jnp.float32),
        "enc_wih_t": u(ks[1], (embed_dim, 3 * hidden_dim), s),          # used in hoisted projection
        "enc_bih":   u(ks[3], (1, 3 * hidden_dim), s),
        "enc_whh":   u(ks[2], (3, hidden_dim, hidden_dim), s),          # gate-stacked, lane aligned
        "enc_bhh":   u(ks[4], (3, 1, hidden_dim), s),
        # decoder
        "dec_embed": jax.random.normal(ks[5], (tgt_vocab, embed_dim), jnp.float32),
        "dec_wih":   u(ks[6], (3, embed_dim, hidden_dim), s),
        "dec_whh":   u(ks[7], (3, hidden_dim, hidden_dim), s),
        "dec_bih":   u(ks[8], (3, 1, hidden_dim), s),
        "dec_bhh":   u(ks[9], (3, 1, hidden_dim), s),
        # w: Linear(2H -> H) split into dec-half / ctx-half of W^T
        "ww_dec": u(ks[10], (hidden_dim, hidden_dim), s2),
        "ww_ctx": u(ks[11], (hidden_dim, hidden_dim), s2),
        "b_w":    u(ks[12], (1, hidden_dim), s2),
        # prediction: Linear(H -> V), padded to Vp lanes (padded bias = -1e9 so argmax ignores it)
        "w_p_t": jnp.zeros((hidden_dim, Vp), jnp.float32).at[:, :tgt_vocab].set(w_p),
        "b_p":   jnp.full((1, Vp), -1e9, jnp.float32).at[:, :tgt_vocab].set(b_p),
    }
    return p


def seq2seq_attn_forward(params, srcs, tgts, tf_ratio=0.5):
    """Training-mode forward of Seq2seqAttn. Returns (outs:(T,B,1,V), loss:scalar)."""
    SOS_token = 2
    EOS_token = 1
    B, S = srcs.shape
    T = tgts.shape[1]
    H = HIDDEN_DIM
    V = params["dec_embed"].shape[0]
    Vp = params["w_p_t"].shape[1]

    # TODO(synk): nn.Dropout is stochastic; treated as identity (eval semantics) here.

    # ----- encoder: embedding + hoisted input projection (single batched matmul) -----
    enc_embs = jnp.take(params["enc_embed"], srcs, axis=0)                       # (B, S, E)
    gi = jnp.einsum("bse,eg->bsg", enc_embs, params["enc_wih_t"]) + params["enc_bih"]
    gi = gi.reshape(B, S, 3, H).transpose(1, 2, 0, 3)                            # (S, 3, B, H)

    enc_outs_sbh = encoder_forward(gi, params["enc_whh"], params["enc_bhh"])     # (S, B, H)
    enc_outs = enc_outs_sbh.transpose(1, 0, 2)                                   # (B, S, H)
    h0 = enc_outs_sbh[S - 1]                                                     # final hidden (B, H)

    # ----- teacher-forcing schedule (trace-time python RNG, as in the reference) -----
    rng = random.Random(0)
    decisions = [rng.random() < tf_ratio for _ in range(T)]
    # step 0 always consumes SOS; step i>0 consumes tgts[:, i-1] iff decision at step i-1
    tf_flags = jnp.array([1] + [int(d) for d in decisions[:T - 1]], dtype=jnp.int32)

    sos_emb = jnp.broadcast_to(params["dec_embed"][SOS_token][None, :], (B, EMBED_DIM))
    tf_embs = jnp.take(params["dec_embed"], tgts[:, :T - 1], axis=0)             # (B, T-1, E)
    inp_embs = jnp.concatenate([sos_emb[:, None, :], tf_embs], axis=1)           # (B, T, E)
    inp_embs = inp_embs.transpose(1, 0, 2)                                       # (T, B, E)

    emb_tbl = jnp.zeros((Vp, EMBED_DIM), jnp.float32).at[:V].set(params["dec_embed"])

    # ----- fused decoder over all T steps (one pallas_call) -----
    preds_all = decoder_forward(tf_flags, inp_embs, h0, enc_outs, emb_tbl, params)  # (T, B, Vp)
    preds = preds_all[:, :, :V]                                                  # (T, B, V)
    outs = preds[:, :, None, :]                                                  # (T, B, 1, V)

    # ----- summed per-step cross entropy with ignore_index = EOS -----
    tgt_tb = tgts.T                                                              # (T, B)
    logz = jax.nn.logsumexp(preds, axis=-1)                                      # (T, B)
    picked = jnp.take_along_axis(preds, tgt_tb[:, :, None], axis=-1)[..., 0]     # (T, B)
    nll = logz - picked
    mask = (tgt_tb != EOS_token).astype(jnp.float32)
    denom = jnp.maximum(jnp.sum(mask, axis=1), 1.0)
    loss = jnp.sum(jnp.sum(nll * mask, axis=1) / denom)
    return outs, loss


# --------------------------------- driver ------------------------------------

if __name__ == "__main__":
    key = jax.random.PRNGKey(0)
    k_params, k_src, k_tgt = jax.random.split(key, 3)

    SRC_VOCAB, TGT_VOCAB = 50, 40
    B, S_SRC, S_TGT = 4, 8, 6

    params = init_params(k_params, SRC_VOCAB, TGT_VOCAB)
    srcs = jax.random.randint(k_src, (B, S_SRC), 0, SRC_VOCAB, dtype=jnp.int32)
    tgts = jax.random.randint(k_tgt, (B, S_TGT), 0, TGT_VOCAB, dtype=jnp.int32)

    outs, loss = seq2seq_attn_forward(params, srcs, tgts, tf_ratio=0.5)
    jax.block_until_ready((outs, loss))

    assert outs.shape == (S_TGT, B, 1, TGT_VOCAB)
    assert bool(jnp.isfinite(loss))
    print("KERNEL_OK")
</pallas_src>

<mosaic_0001>
module attributes {stable_mosaic.version = 11 : i64} {
  func.func @_enc_gru_kernel(%arg0: i32, %arg1: memref<1x3x4x150xf32, #tpu.memory_space<vmem>>, %arg2: memref<3x150x150xf32, #tpu.memory_space<vmem>>, %arg3: memref<3x1x150xf32, #tpu.memory_space<vmem>>, %arg4: memref<1x4x150xf32, #tpu.memory_space<vmem>>, %arg5: memref<4x150xf32, #tpu.memory_space<vmem>>) attributes {dimension_semantics = [#tpu.dimension_semantics<arbitrary>], iteration_bounds = array<i64: 8>, scalar_prefetch = 0 : i64, scratch_operands = 1 : i64, tpu.core_type = #tpu.core_type<tc>, window_params = [{transform_indices = @transform_0, window_bounds = array<i64: 1, 3, 4, 150>}, {pipeline_mode = #tpu.pipeline_mode<synchronous>, transform_indices = @transform_1, window_bounds = array<i64: 3, 150, 150>}, {pipeline_mode = #tpu.pipeline_mode<synchronous>, transform_indices = @transform_2, window_bounds = array<i64: 3, 1, 150>}, {transform_indices = @transform_3, window_bounds = array<i64: 1, 4, 150>}]} {
    %c0_i32 = arith.constant 0 : i32
    %0 = arith.cmpi eq, %arg0, %c0_i32 : i32
    %1 = arith.extui %0 : i1 to i32
    %c0_i32_0 = arith.constant 0 : i32
    %2 = arith.cmpi ne, %1, %c0_i32_0 : i32
    scf.if %2 {
      %cst_32 = arith.constant 0.000000e+00 : f32
      %57 = vector.broadcast %cst_32 : f32 to vector<4x150xf32>
      %c0_33 = arith.constant 0 : index
      %c0_34 = arith.constant 0 : index
      %58 = vector.load %arg5[%c0_33, %c0_34] : memref<4x150xf32, #tpu.memory_space<vmem>>, vector<4x150xf32>
      tpu.vector_store %arg5[%c0_33, %c0_34], %57 {strides = array<i32>} : memref<4x150xf32, #tpu.memory_space<vmem>>, vector<4x150xf32>,
    } else {
    }
    %c0 = arith.constant 0 : index
    %c0_1 = arith.constant 0 : index
    %3 = vector.load %arg5[%c0, %c0_1] : memref<4x150xf32, #tpu.memory_space<vmem>>, vector<4x150xf32>
    %c0_2 = arith.constant 0 : index
    %c0_3 = arith.constant 0 : index
    %c0_4 = arith.constant 0 : index
    %c0_5 = arith.constant 0 : index
    %4 = vector.load %arg1[%c0_2, %c0_3, %c0_4, %c0_5] : memref<1x3x4x150xf32, #tpu.memory_space<vmem>>, vector<1x3x4x150xf32>
    %5 = vector.shape_cast %4 : vector<1x3x4x150xf32> to vector<3x4x150xf32>
    %c0_6 = arith.constant 0 : index
    %c0_7 = arith.constant 0 : index
    %c0_8 = arith.constant 0 : index
    %6 = vector.load %arg2[%c0_6, %c0_7, %c0_8] : memref<3x150x150xf32, #tpu.memory_space<vmem>>, vector<1x150x150xf32>
    %7 = vector.shape_cast %6 : vector<1x150x150xf32> to vector<150x150xf32>
    %cst = arith.constant dense<0.000000e+00> : vector<4x150xf32>
    %8 = tpu.matmul %3, %7, %cst {dimension_numbers = #tpu.dot_dimension_numbers<[1], [0], [0], [1], [0, 0, 1, 1], [], []>} : vector<4x150xf32>, vector<150x150xf32>, vector<4x150xf32> -> vector<4x150xf32>
    %c0_9 = arith.constant 0 : index
    %c0_10 = arith.constant 0 : index
    %c0_11 = arith.constant 0 : index
    %9 = vector.load %arg3[%c0_9, %c0_10, %c0_11] : memref<3x1x150xf32, #tpu.memory_space<vmem>>, vector<1x1x150xf32>
    %10 = vector.shape_cast %9 : vector<1x1x150xf32> to vector<1x150xf32>
    %11 = vector.broadcast %10 : vector<1x150xf32> to vector<4x150xf32>
    %12 = arith.addf %8, %11 : vector<4x150xf32>
    %c1 = arith.constant 1 : index
    %c0_12 = arith.constant 0 : index
    %c0_13 = arith.constant 0 : index
    %13 = vector.load %arg2[%c1, %c0_12, %c0_13] : memref<3x150x150xf32, #tpu.memory_space<vmem>>, vector<1x150x150xf32>
    %14 = vector.shape_cast %13 : vector<1x150x150xf32> to vector<150x150xf32>
    %cst_14 = arith.constant dense<0.000000e+00> : vector<4x150xf32>
    %15 = tpu.matmul %3, %14, %cst_14 {dimension_numbers = #tpu.dot_dimension_numbers<[1], [0], [0], [1], [0, 0, 1, 1], [], []>} : vector<4x150xf32>, vector<150x150xf32>, vector<4x150xf32> -> vector<4x150xf32>
    %c1_15 = arith.constant 1 : index
    %c0_16 = arith.constant 0 : index
    %c0_17 = arith.constant 0 : index
    %16 = vector.load %arg3[%c1_15, %c0_16, %c0_17] : memref<3x1x150xf32, #tpu.memory_space<vmem>>, vector<1x1x150xf32>
    %17 = vector.shape_cast %16 : vector<1x1x150xf32> to vector<1x150xf32>
    %18 = vector.broadcast %17 : vector<1x150xf32> to vector<4x150xf32>
    %19 = arith.addf %15, %18 : vector<4x150xf32>
    %c2 = arith.constant 2 : index
    %c0_18 = arith.constant 0 : index
    %c0_19 = arith.constant 0 : index
    %20 = vector.load %arg2[%c2, %c0_18, %c0_19] : memref<3x150x150xf32, #tpu.memory_space<vmem>>, vector<1x150x150xf32>
    %21 = vector.shape_cast %20 : vector<1x150x150xf32> to vector<150x150xf32>
    %cst_20 = arith.constant dense<0.000000e+00> : vector<4x150xf32>
    %22 = tpu.matmul %3, %21, %cst_20 {dimension_numbers = #tpu.dot_dimension_numbers<[1], [0], [0], [1], [0, 0, 1, 1], [], []>} : vector<4x150xf32>, vector<150x150xf32>, vector<4x150xf32> -> vector<4x150xf32>
    %c2_21 = arith.constant 2 : index
    %c0_22 = arith.constant 0 : index
    %c0_23 = arith.constant 0 : index
    %23 = vector.load %arg3[%c2_21, %c0_22, %c0_23] : memref<3x1x150xf32, #tpu.memory_space<vmem>>, vector<1x1x150xf32>
    %24 = vector.shape_cast %23 : vector<1x1x150xf32> to vector<1x150xf32>
    %25 = vector.broadcast %24 : vector<1x150xf32> to vector<4x150xf32>
    %26 = arith.addf %22, %25 : vector<4x150xf32>
    %27 = vector.extract_strided_slice %5 {offsets = [0, 0, 0], sizes = [1, 4, 150], strides = [1, 1, 1]} : vector<3x4x150xf32> to vector<1x4x150xf32>
    %28 = vector.shape_cast %27 : vector<1x4x150xf32> to vector<4x150xf32>
    %29 = arith.addf %28, %12 : vector<4x150xf32>
    %30 = arith.negf %29 : vector<4x150xf32>
    %31 = math.exp %30 : vector<4x150xf32>
    %cst_24 = arith.constant 1.000000e+00 : f32
    %32 = vector.broadcast %cst_24 : f32 to vector<4x150xf32>
    %33 = arith.addf %32, %31 : vector<4x150xf32>
    %34 = arith.divf %32, %33 : vector<4x150xf32>
    %35 = vector.extract_strided_slice %5 {offsets = [1, 0, 0], sizes = [1, 4, 150], strides = [1, 1, 1]} : vector<3x4x150xf32> to vector<1x4x150xf32>
    %36 = vector.shape_cast %35 : vector<1x4x150xf32> to vector<4x150xf32>
    %37 = arith.addf %36, %19 : vector<4x150xf32>
    %38 = arith.negf %37 : vector<4x150xf32>
    %39 = math.exp %38 : vector<4x150xf32>
    %cst_25 = arith.constant 1.000000e+00 : f32
    %40 = vector.broadcast %cst_25 : f32 to vector<4x150xf32>
    %41 = arith.addf %40, %39 : vector<4x150xf32>
    %42 = arith.divf %40, %41 : vector<4x150xf32>
    %43 = vector.extract_strided_slice %5 {offsets = [2, 0, 0], sizes = [1, 4, 150], strides = [1, 1, 1]} : vector<3x4x150xf32> to vector<1x4x150xf32>
    %44 = vector.shape_cast %43 : vector<1x4x150xf32> to vector<4x150xf32>
    %45 = arith.mulf %34, %26 : vector<4x150xf32>
    %46 = arith.addf %44, %45 : vector<4x150xf32>
    %47 = math.tanh %46 : vector<4x150xf32>
    %cst_26 = arith.constant 1.000000e+00 : f32
    %48 = vector.broadcast %cst_26 : f32 to vector<4x150xf32>
    %49 = arith.subf %48, %42 : vector<4x150xf32>
    %50 = arith.mulf %49, %47 : vector<4x150xf32>
    %51 = arith.mulf %42, %3 : vector<4x150xf32>
    %52 = arith.addf %50, %51 : vector<4x150xf32>
    %c0_27 = arith.constant 0 : index
    %c0_28 = arith.constant 0 : index
    %53 = vector.load %arg5[%c0_27, %c0_28] : memref<4x150xf32, #tpu.memory_space<vmem>>, vector<4x150xf32>
    tpu.vector_store %arg5[%c0_27, %c0_28], %52 {strides = array<i32>} : memref<4x150xf32, #tpu.memory_space<vmem>>, vector<4x150xf32>,
    %c0_29 = arith.constant 0 : index
    %c0_30 = arith.constant 0 : index
    %c0_31 = arith.constant 0 : index
    %54 = vector.load %arg4[%c0_29, %c0_30, %c0_31] : memref<1x4x150xf32, #tpu.memory_space<vmem>>, vector<1x4x150xf32>
    %55 = vector.shape_cast %54 : vector<1x4x150xf32> to vector<4x150xf32>
    %56 = vector.shape_cast %52 : vector<4x150xf32> to vector<1x4x150xf32>
    tpu.vector_store %arg4[%c0_29, %c0_30, %c0_31], %56 {strides = array<i32>} : memref<1x4x150xf32, #tpu.memory_space<vmem>>, vector<1x4x150xf32>,
    return
  }
  func.func @transform_0(%arg0: i32) -> (i32, i32, i32, i32) {
    %c0_i32 = arith.constant 0 : i32
    %c0_i32_0 = arith.constant 0 : i32
    %c0_i32_1 = arith.constant 0 : i32
    %c0_i32_2 = arith.constant 0 : i32
    return %arg0, %c0_i32, %c0_i32_0, %c0_i32_1 : i32, i32, i32, i32
  }
  func.func @transform_1(%arg0: i32) -> (i32, i32, i32) {
    %c0_i32 = arith.constant 0 : i32
    %c0_i32_0 = arith.constant 0 : i32
    %c0_i32_1 = arith.constant 0 : i32
    %c0_i32_2 = arith.constant 0 : i32
    return %c0_i32, %c0_i32_0, %c0_i32_1 : i32, i32, i32
  }
  func.func @transform_2(%arg0: i32) -> (i32, i32, i32) {
    %c0_i32 = arith.constant 0 : i32
    %c0_i32_0 = arith.constant 0 : i32
    %c0_i32_1 = arith.constant 0 : i32
    %c0_i32_2 = arith.constant 0 : i32
    return %c0_i32, %c0_i32_0, %c0_i32_1 : i32, i32, i32
  }
  func.func @transform_3(%arg0: i32) -> (i32, i32, i32) {
    %c0_i32 = arith.constant 0 : i32
    %c0_i32_0 = arith.constant 0 : i32
    %c0_i32_1 = arith.constant 0 : i32
    return %arg0, %c0_i32, %c0_i32_0 : i32, i32, i32
  }
}

</mosaic_0001>

<bundles_post_ra>
// kernel: tpu_custom_call.1
= control target key start
LH: loop header
LB: loop body
LE: loop exit
PB: predicated region body
PF: predicated region fallthrough
CT: control target
= control target key end

     0   :  { %8 = vsyncpa [#allocation4], 0  ;;  %s1323_s0 = inlined_call_operand.hbm [shape: f32[8,3,4,150], index: 0, kind: input, shape index: {}]   ;;  %s1324_s1 = inlined_call_operand.hbm [shape: f32[3,150,150], index: 1, kind: input, shape index: {}]   ;;  %s1325_s2 = inlined_call_operand.hbm [shape: f32[3,1,150], index: 2, kind: input, shape index: {}]   ;;  %s1326_s3 = inlined_call_operand.hbm [shape: f32[8,4,150], index: 3, kind: output, shape index: {}]  }
   0x1   :  { %10 = vsyncpa [#allocation4 + $0x1], 0 }
   0x2   :  { %11 = vsyncpa [#allocation7], 0 }
   0x3   :  { %12 = vsyncpa [#allocation5], 0 }
   0x4   :  { %14 = vsyncpa [#allocation5 + $0x1], 0  ;;  %s1133_s12 = smov 0   ;;  %s1135_s13 = smov 0  }
   0x5   :  { %s1137_s14 = smov 0   ;;  %s1139_s15 = smov 0  }
   0x6 LB: > { %s1154_s16 = sadd.s32 4294967295, %s1102_s15   ;;  %s824_s17 = sadd.s32 4294967294, %s1102_s15   ;;  %s1102_s15 = sphi %s1139_s15, %s1336_s15   ;;  %s1098_s14 = sphi %s1137_s14, %s1335_s14   ;;  %s1094_s13 = sphi %s1135_s13, %s1334_s13   ;;  %s1090_s12 = sphi %s1133_s12, %s1333_s12  }
   0x7   : > { %p40_p0 = scmp.ne.s32.totalorder %s1094_s13, %s1090_s12  ;;  %p41_p1 = scmp.eq.s32.totalorder %s1154_s16, 0 }
   0x8   : > { %p106_p2 = scmp.eq.s32.totalorder %s1154_s16, 7  ;;  %p112_p3 = scmp.eq.s32.totalorder %s824_s17, 7 }
   0x9   : > { %p1163_p4 = por %p41_p1, %p40_p0  ;;  %p825_p5 = scmp.ge.s32.totalorder %s1102_s15, 1 }
   0xa   : > { %p1168_p6 = por %p112_p3, %p40_p0  ;;  %p119_p7 = scmp.lt.s32.totalorder %s1102_s15, 9 }
   0xb   : > { %s130_s22 = sshll.u32 %s1324_s1, 4  ;;  %s1104_s24 = smov [#allocation6]   ;;  %s131_s22 = int_to_ptr.hbm [resolvable:$true] %s130_s22 }
   0xc   : > { %p1177_p9 = pnand %p825_p5, %p119_p7  ;;  %s132_s25 = sshll.u32 %s1104_s24, 4  ;;  %s133_s25 = int_to_ptr.vmem [resolvable:$true] %s132_s25 }
   0xd   : > { %s144_s28 = sshll.u32 %s1325_s2, 4  ;;  %s1105_s29 = smov 256   ;;  %s145_s28 = int_to_ptr.hbm [resolvable:$true] %s144_s28 }
   0xe   : > { %p870_p10 = pneg %p1177_p9  ;;  %s1106_s30 = smov 16  }
   0xf   : > { %s1107_s4 = smov [#allocation8]   ;;  %s1108_s6 = smov 32  }
  0x10   : > { %p871_p11 = pnand %p870_p10, %p41_p1  ;;  %s146_s5 = sshll.u32 %s1107_s4, 4  ;;  %s147_s5 = int_to_ptr.vmem [resolvable:$true] %s146_s5 }
  0x11   : > { %s1109_s7 = smov 2   ;;  %s1189_s8 = sadd.s32 1, %s1102_s15  }
  0x12   : > { %873 = dma.hbm_to_vmem [thread:$0]  (!%p871_p11), %s131_s22, 14592, %s133_s25, [#allocation7], %s1105_s29, %s1105_s29, %s1106_s30  }
  0x13   : > { %876 = dma.hbm_to_vmem [thread:$0]  (!%p871_p11), %s145_s28, 96, %s147_s5, [#allocation7], %s1108_s6, %s1108_s6, %s1109_s7  }
  0x14   : > { %s24_s9 = ssub.s32 %s1102_s15, %s1189_s8  ;;  %s27_s10 = sadd.s32 1, %s1098_s14 }
  0x15   : > { %p25_p12 = scmp.eq.s32.totalorder %s24_s9, 0  ;;  %p34_p13 = scmp.ne.s32.totalorder %s1098_s14, %s1094_s13 }
  0x16   : > { %p35_p0 = scmp.eq.s32.totalorder %s1102_s15, 0  ;;  %p887_p7 = scmp.lt.s32.totalorder %s1102_s15, 8 }
  0x17   : > { %s1198_s11 = scalar_select %p25_p12, %s1098_s14, %s27_s10  }
  0x18   : > { %p36_p3 = por %p35_p0, %p34_p13  ;;  %p1202_p5 = por %p106_p2, %p34_p13 }
  0x19   : > { %s160_s20 = sand.u32 1, %s1098_s14   ;;  %s856_s22 = smul.u32 24, %s1102_s15 }
  0x1a   : > { %s855_s21 = smul.u32 24, %s160_s20  ;;  %p1209_p10 = pnand %p887_p7, %p36_p3 }
  0x1b   : > { %s169_s27 = scalar_lea.hbm %s1323_s0, %s856_s22  ;;  %s161_s4 = scalar_lea.sflag [#allocation4], %s160_s20 }
  0x1c   : > { %s164_s28 = scalar_lea.vmem [#allocation3], %s855_s21  ;;  %s170_s30 = sshll.u32 %s169_s27, 4  ;;  %s171_s30 = int_to_ptr.hbm [resolvable:$true] %s170_s30 }
  0x1d   : > { %s172_s29 = sshll.u32 %s164_s28, 4  ;;  %s1002_s5 = sshra.s32 %s171_s30, 4  ;;  %s173_s29 = int_to_ptr.vmem [resolvable:$true] %s172_s29  ;;  %s1003_s5 = int_to_ptr.hbm [resolvable:$true] %s1002_s5 }
  0x1e   : > { %s1004_s6 = scalar_lea.hbm %s1003_s5, 24  ;;  %p1006_p11 = pneg %p1209_p10 }
  0x1f   : > { %p1005_p2 = scmp.ne.s32.totalorder %s1003_s5, %s1004_s6  ;;  %s1009_s10 = scalar_lea.hbm %s1323_s0, 192 }
  0x20   : > { %p1010_p0 = scmp.lt.s32.totalorder %s1003_s5, %s1323_s0  ;;  %p1011_p3 = scmp.lt.s32.totalorder %s1009_s10, %s1004_s6 }
  0x21   : > { %p1007_p12 = pnand %p1006_p11, %p1005_p2 }
  0x22   : > { %p1012_p7 = por %p1011_p3, %p1010_p0 }
  0x23   : > { %p1008_p13 = pneg %p1007_p12 }
  0x25   : > { %p1013_p8 = pnand %p1012_p7, %p1008_p13 }
  0x27   : > { %1016 = shalt.err (!%p1013_p8)
}
  0x28   : > { %s1110_s20 = smov 128   ;;  %s1111_s21 = smov 8  }
  0x29   : > { %880 = dma.hbm_to_vmem [thread:$0]  (!%p1209_p10), %s171_s30, 384, %s173_s29, %s161_s4, %s1110_s20, %s1110_s20, %s1111_s21  }
  0x2a   : > { %184 = sbr.rel (%p1177_p9) target bundleno = 293 (0x125), region = 32  ;;  %s1229_s26 = sand.u32 (!%p1177_p9), 1, %s1094_s13  }
  0x2b   : > { %s857_s27 = smul.u32 (!%p1177_p9), 24, %s1229_s26  ;;  %s187_s28 = scalar_lea.sflag (!%p1177_p9), [#allocation4], %s1229_s26 }
  0x2d   : > { %s1233_s5 = scalar_lea.vmem (!%p1177_p9), [#allocation3], %s857_s27 }
  0x2f   : > { %1077 = dma.done.wait (%p1163_p4), %s187_s28, 384  }
  0x30   : > { %1079 = vsyncadd (%p1163_p4), %s187_s28, 4294966912 }
  0x31   : > { %1081 = dma.done.wait (%p41_p1), [#allocation7], 14688  }
  0x32   : > { %1083 = vsyncadd (%p41_p1), [#allocation7], 4294952608  ;;  %s833_s23 = sshll.u32 %s1229_s26, 3  ;;  %p1332_p8 = scmp.ne.s32.totalorder %s1154_s16, 0 }
  0x33   : > { %s1244_s24 = scalar_lea.vmem [#allocation9], %s833_s23 }
  0x34   : > { %227 = sbr.rel (%p1332_p8) target bundleno = 60 (0x3c), region = 48 }
  0x39   : > { %vm228_vm0 = vcmask 1043456   ;;  %vm229_vm1 = vcmask 179204   ;;  %v1112_v0 = vmov 0.0  }
  0x3a   : > { %vm230_vm2 = vmor %vm229_vm1, %vm228_vm0 }
  0x3b   : > { %231 = vst.msk [vmem:[#allocation2] sm:$0xff] %vm230_vm2, %v1112_v0 }
  0x3c PF: > { %v267_v1 = vld [vmem:[#allocation6 + $0xf8] sm:$0xff]  ;;  %v273_v2 = vld [vmem:[#allocation6 + $0x128] sm:$0x3f]  ;;  %vm288_vm3 = vcmask 1045504   ;;  %v272_v3 = vld [vmem:[#allocation6 + $0x120] sm:$0x3f] }
  0x3d   : > { %335 = vmatpush.msra.mxu2 %v267_v1  ;;  %837 = vmatpush.msk.msra.mxu3 %vm288_vm3, %v273_v2  ;;  %v265_v4 = vld [vmem:[#allocation6 + $0xe8] sm:$0xff]  ;;  %v271_v5 = vld [vmem:[#allocation6 + $0x118] sm:$0xff]  ;;  %v270_v6 = vld [vmem:[#allocation6 + $0x110] sm:$0xff]  ;;  %vm285_vm4 = vcmask 179200   ;;  %vm654_vm5 = vcmask 1043456   ;;  %s854_s18 = sshll.u32 %s1154_s16, 3 }
  0x3e   : > { %835 = vmatpush.msk.msra.mxu1 %vm288_vm3, %v272_v3  ;;  %v266_v7 = vld [vmem:[#allocation6 + $0xf0] sm:$0xff]  ;;  %v263_v8 = vld [vmem:[#allocation6 + $0xd8] sm:$0xff]  ;;  %v269_v9 = vld [vmem:[#allocation6 + $0x108] sm:$0xff]  ;;  %s730_s4 = scalar_lea.hbm %s1326_s3, %s854_s18  ;;  %vm714_vm14 = vcmask 179204   ;;  %s732_s6 = sshll.u32 %s1244_s24, 4  ;;  %s733_s6 = int_to_ptr.vmem [resolvable:$true] %s732_s6 }
  0x3f   : > { %336 = vmatpush.msra.mxu2 %v265_v4  ;;  %369 = vmatpush.msra.mxu3 %v271_v5  ;;  %v268_v10 = vld [vmem:[#allocation6 + $0x100] sm:$0xff]  ;;  %v412_v11 = vld [vmem:[#allocation6 + $0x250] sm:$0x3f]  ;;  %v261_v13 = vld [vmem:[#allocation6 + $0xc8] sm:$0xff]  ;;  %s734_s16 = sshll.u32 %s730_s4, 4  ;;  %s719_s7 = scalar_lea.sflag [#allocation5], %s1229_s26  ;;  %s735_s16 = int_to_ptr.hbm [resolvable:$true] %s734_s16 }
  0x40   : > { %329 = vmatpush.msra.mxu1 %v270_v6  ;;  %295 = vmatpush.msra.mxu0 %v266_v7  ;;  %v264_v12 = vld [vmem:[#allocation6 + $0xe0] sm:$0xff]  ;;  %v262_v16 = vld [vmem:[#allocation6 + $0xd0] sm:$0xff]  ;;  %v259_v17 = vld [vmem:[#allocation6 + $0xb8] sm:$0xff]  ;;  %s1046_s9 = sshra.s32 %s735_s16, 4  ;;  %s1052_s20 = scalar_lea.hbm %s1326_s3, 64  ;;  %s1047_s9 = int_to_ptr.hbm [resolvable:$true] %s1046_s9 }
  0x41   : > { %337 = vmatpush.msra.mxu2 %v263_v8  ;;  %370 = vmatpush.msra.mxu3 %v269_v9  ;;  %v406_v14 = vld [vmem:[#allocation6 + $0x220] sm:$0xff]  ;;  %v404_v18 = vld [vmem:[#allocation6 + $0x210] sm:$0xff]  ;;  %v257_v22 = vld [vmem:[#allocation6 + $0xa8] sm:$0xff]  ;;  %s1048_s10 = scalar_lea.hbm %s1047_s9, 8  ;;  %p1053_p10 = scmp.lt.s32.totalorder %s1047_s9, %s1326_s3 }
  0x42   : > { %v410_v15 = vld [vmem:[#allocation6 + $0x240] sm:$0xff]  ;;  %330 = vmatpush.msra.mxu1 %v268_v10  ;;  %296 = vmatpush.msra.mxu0 %v264_v12  ;;  %v408_v19 = vld [vmem:[#allocation6 + $0x230] sm:$0xff]  ;;  %v1251_v20 = vld [vmem:[#allocation2] sm:$0xff]  ;;  %p1049_p1 = scmp.ne.s32.totalorder %s1047_s9, %s1048_s10  ;;  %p1054_p2 = scmp.lt.s32.totalorder %s1052_s20, %s1048_s10 }
  0x43   : > { %839 = vmatpush.msk.msrb.mxu3 %vm288_vm3, %v412_v11  ;;  %338 = vmatpush.msra.mxu2 %v261_v13  ;;  %v260_v21 = vld [vmem:[#allocation6 + $0xc0] sm:$0xff]  ;;  %281 = vst [vmem:[#allocation1] ss:$2 sm:$0xff] %v1251_v20  ;;  %v258_v24 = vld [vmem:[#allocation6 + $0xb0] sm:$0xff]  ;;  %v255_v25 = vld [vmem:[#allocation6 + $0x98] sm:$0xff] }
  0x44   : > { %433 = vmatpush.msrb.mxu1 %v406_v14  ;;  %297 = vmatpush.msra.mxu0 %v262_v16  ;;  %v402_v23 = vld [vmem:[#allocation6 + $0x200] sm:$0xff]  ;;  %v400_v26 = vld [vmem:[#allocation6 + $0x1f0] sm:$0xff]  ;;  %v253_v28 = vld [vmem:[#allocation6 + $0x88] sm:$0xff]  ;;  %p1050_p4 = pnand %p1049_p1, %p1202_p5  ;;  %p1055_p11 = por %p1054_p2, %p1053_p10 }
  0x45   : > { %467 = vmatpush.msrb.mxu3 %v410_v15  ;;  %339 = vmatpush.msra.mxu2 %v259_v17  ;;  %v256_v27 = vld [vmem:[#allocation6 + $0xa0] sm:$0xff]  ;;  %v407_v30 = vld [vmem:[#allocation6 + $0x228] sm:$0xff]  ;;  %v254_v31 = vld [vmem:[#allocation6 + $0x90] sm:$0xff] }
  0x46   : > { %434 = vmatpush.msrb.mxu1 %v404_v18  ;;  %298 = vmatpush.msra.mxu0 %v260_v21  ;;  %v398_v29 = vld [vmem:[#allocation6 + $0x1e0] sm:$0xff]  ;;  %v251_v33 = vld [vmem:[#allocation6 + $0x78] sm:$0xff]  ;;  %v396_v34 = vld [vmem:[#allocation6 + $0x1d0] sm:$0xff]  ;;  %p1051_p9 = pneg %p1050_p4 }
  0x47   : > { %468 = vmatpush.msrb.mxu3 %v408_v19  ;;  %340 = vmatpush.msra.mxu2 %v257_v22  ;;  %v405_v35 = vld [vmem:[#allocation6 + $0x218] sm:$0xff]  ;;  %v252_v36 = vld [vmem:[#allocation6 + $0x80] sm:$0xff]  ;;  %v249_v37 = vld [vmem:[#allocation6 + $0x68] sm:$0xff] }
  0x48   : > { %435 = vmatpush.msrb.mxu1 %v402_v23  ;;  %299 = vmatpush.msra.mxu0 %v258_v24  ;;  %v394_v38 = vld [vmem:[#allocation6 + $0x1c0] sm:$0xff]  ;;  %v403_v39 = vld [vmem:[#allocation6 + $0x208] sm:$0xff]  ;;  %v250_v40 = vld [vmem:[#allocation6 + $0x70] sm:$0xff]  ;;  %p1056_p12 = pnand %p1055_p11, %p1051_p9 }
  0x49   : > { %341 = vmatpush.msra.mxu2 %v255_v25  ;;  %v247_v41 = vld [vmem:[#allocation6 + $0x58] sm:$0xff]  ;;  %v392_v42 = vld [vmem:[#allocation6 + $0x1b0] sm:$0xff]  ;;  %v248_v44 = vld [vmem:[#allocation6 + $0x60] sm:$0xff] }
  0x4a   : > { %436 = vmatpush.msrb.mxu1 %v400_v26  ;;  %v1254_v32 = vld.sshfl [vmem:[#allocation1 + $0x8] sm:$0xff pattern:$0x75316420]  ;;  %300 = vmatpush.msra.mxu0 %v256_v27  ;;  %v401_v43 = vld [vmem:[#allocation6 + $0x1f8] sm:$0xff]  ;;  %v390_v46 = vld [vmem:[#allocation6 + $0x1a0] sm:$0xff] }
  0x4b   : > { %342 = vmatpush.msra.mxu2 %v253_v28  ;;  %838 = vmatmul.msk.f32.vlgmr.msra.gmra.mxu3 %vm285_vm4, %v1254_v32  ;;  %v245_v45 = vld [vmem:[#allocation6 + $0x48] sm:$0xff]  ;;  %v1258_v47 = vld.sshfl [vmem:[#allocation1] sm:$0xff pattern:$0x75316420]  ;;  %v246_v49 = vld [vmem:[#allocation6 + $0x50] sm:$0xff] }
  0x4c   : > { %437 = vmatpush.msrb.mxu1 %v398_v29  ;;  %473 = vmatpush.msra.mxu3 %v407_v30  ;;  %v399_v48 = vld [vmem:[#allocation6 + $0x1e8] sm:$0xff]  ;;  %421 = vst [vmem:[#allocation1] ss:$2 sm:$0xff] %v1251_v20  ;;  %v243_v50 = vld [vmem:[#allocation6 + $0x38] sm:$0xff]  ;;  %v388_v51 = vld [vmem:[#allocation6 + $0x190] sm:$0xff] }
  0x4d   : > { %301 = vmatpush.msra.mxu0 %v254_v31  ;;  %343 = vmatpush.msra.mxu2 %v251_v33  ;;  %v397_v52 = vld [vmem:[#allocation6 + $0x1d8] sm:$0xff]  ;;  %v244_v53 = vld [vmem:[#allocation6 + $0x40] sm:$0xff]  ;;  %v241_v54 = vld [vmem:[#allocation6 + $0x28] sm:$0xff] }
  0x4e   : > { %438 = vmatpush.msrb.mxu1 %v396_v34  ;;  %474 = vmatpush.msra.mxu3 %v405_v35  ;;  %v386_v55 = vld [vmem:[#allocation6 + $0x180] sm:$0xff]  ;;  %v395_v56 = vld [vmem:[#allocation6 + $0x1c8] sm:$0xff]  ;;  %v242_v57 = vld [vmem:[#allocation6 + $0x30] sm:$0xff] }
  0x4f   : > { %302 = vmatpush.msra.mxu0 %v252_v36  ;;  %344 = vmatpush.msra.mxu2 %v249_v37  ;;  %v239_v58 = vld [vmem:[#allocation6 + $0x18] sm:$0xff]  ;;  %v384_v59 = vld [vmem:[#allocation6 + $0x170] sm:$0xff]  ;;  %v240_v61 = vld [vmem:[#allocation6 + $0x20] sm:$0xff] }
  0x50   : > { %439 = vmatpush.msrb.mxu1 %v394_v38  ;;  %475 = vmatpush.msra.mxu3 %v403_v39  ;;  %v393_v60 = vld [vmem:[#allocation6 + $0x1b8] sm:$0xff]  ;;  %v237_v62 = vld [vmem:[#allocation6 + $0x8] sm:$0xff]  ;;  %v382_v2 = vld [vmem:[#allocation6 + $0x160] sm:$0xff] }
  0x51   : > { %303 = vmatpush.msra.mxu0 %v250_v40  ;;  %345 = vmatpush.msra.mxu2 %v247_v41  ;;  %v391_v1 = vld [vmem:[#allocation6 + $0x1a8] sm:$0xff]  ;;  %v238_v3 = vld [vmem:[#allocation6 + $0x10] sm:$0xff]  ;;  %v389_v4 = vld [vmem:[#allocation6 + $0x198] sm:$0xff] }
  0x52   : > { %440 = vmatpush.msrb.mxu1 %v392_v42  ;;  %476 = vmatpush.msra.mxu3 %v401_v43  ;;  %v544_v5 = vld [vmem:[#allocation6 + $0x350] sm:$0xff]  ;;  %v387_v7 = vld [vmem:[#allocation6 + $0x188] sm:$0xff]  ;;  %v542_v8 = vld [vmem:[#allocation6 + $0x340] sm:$0xff] }
  0x53   : > { %304 = vmatpush.msra.mxu0 %v248_v44  ;;  %346 = vmatpush.msra.mxu2 %v245_v45  ;;  %v1261_v63 = vld.sshfl [vmem:[#allocation1 + $0x8] sm:$0xff pattern:$0x75316420]  ;;  %v1263_v0 = vld.sshfl [vmem:[#allocation1] sm:$0xff pattern:$0x75316420]  ;;  %vm715_vm15 = vmor %vm714_vm14, %vm654_vm5 }
  0x54   : > { %441 = vmatpush.msrb.mxu1 %v390_v46  ;;  %477 = vmatpush.msra.mxu3 %v399_v48  ;;  %559 = vst [vmem:[#allocation1] ss:$2 sm:$0xff] %v1251_v20  ;;  %v380_v6 = vld [vmem:[#allocation6 + $0x150] sm:$0xff]  ;;  %v236_v9 = vld [vmem:[#allocation6] sm:$0xff]  ;;  %v385_v11 = vld [vmem:[#allocation6 + $0x178] sm:$0xff] }
  0x55   : > { %305 = vmatpush.msra.mxu0 %v246_v49  ;;  %347 = vmatpush.msra.mxu2 %v243_v50  ;;  %v378_v10 = vld [vmem:[#allocation6 + $0x140] sm:$0xff]  ;;  %v540_v12 = vld [vmem:[#allocation6 + $0x330] sm:$0xff]  ;;  %v545_v13 = vld [vmem:[#allocation6 + $0x358] sm:$0xff] }
  0x56   : > { %442 = vmatpush.msrb.mxu1 %v388_v51  ;;  %478 = vmatpush.msra.mxu3 %v397_v52  ;;  %v376_v14 = vld [vmem:[#allocation6 + $0x130] sm:$0xff]  ;;  %v383_v15 = vld [vmem:[#allocation6 + $0x168] sm:$0xff]  ;;  %v538_v16 = vld [vmem:[#allocation6 + $0x320] sm:$0xff] }
  0x57   : > { %306 = vmatpush.msra.mxu0 %v244_v53  ;;  %348 = vmatpush.msra.mxu2 %v241_v54  ;;  %v543_v17 = vld [vmem:[#allocation6 + $0x348] sm:$0xff]  ;;  %v381_v18 = vld [vmem:[#allocation6 + $0x158] sm:$0xff]  ;;  %v536_v19 = vld [vmem:[#allocation6 + $0x310] sm:$0xff] }
  0x58   : > { %443 = vmatpush.msrb.mxu1 %v386_v55  ;;  %479 = vmatpush.msra.mxu3 %v395_v56  ;;  %v541_v21 = vld [vmem:[#allocation6 + $0x338] sm:$0xff]  ;;  %v379_v22 = vld [vmem:[#allocation6 + $0x148] sm:$0xff]  ;;  %v550_v23 = vld [vmem:[#allocation6 + $0x380] sm:$0x3f] }
  0x59   : > { %307 = vmatpush.msra.mxu0 %v242_v57  ;;  %349 = vmatpush.msra.mxu2 %v239_v58  ;;  %v534_v24 = vld [vmem:[#allocation6 + $0x300] sm:$0xff]  ;;  %v539_v25 = vld [vmem:[#allocation6 + $0x328] sm:$0xff]  ;;  %v377_v26 = vld [vmem:[#allocation6 + $0x138] sm:$0xff] }
  0x5a   : > { %444 = vmatpush.msrb.mxu1 %v384_v59  ;;  %480 = vmatpush.msra.mxu3 %v393_v60  ;;  %v548_v27 = vld [vmem:[#allocation6 + $0x370] sm:$0xff]  ;;  %v413_v29 = vld [vmem:[#allocation6 + $0x258] sm:$0x3f]  ;;  %v530_v31 = vld [vmem:[#allocation6 + $0x2e0] sm:$0xff] }
  0x5b   : > { %836 = vmatmul.msk.f32.vlgmr.msra.gmra.mxu1 %vm285_vm4, %v1254_v32  ;;  %308 = vmatpush.msra.mxu0 %v240_v61  ;;  %v532_v28 = vld [vmem:[#allocation6 + $0x2f0] sm:$0xff]  ;;  %v537_v30 = vld [vmem:[#allocation6 + $0x318] sm:$0xff]  ;;  %v546_v32 = vld [vmem:[#allocation6 + $0x360] sm:$0xff] }
  0x5c   : > { %350 = vmatpush.msra.mxu2 %v237_v62  ;;  %481 = vmatpush.msra.mxu3 %v391_v1  ;;  %v411_v33 = vld [vmem:[#allocation6 + $0x248] sm:$0xff]  ;;  %v528_v35 = vld [vmem:[#allocation6 + $0x2d0] sm:$0xff]  ;;  %v409_v37 = vld [vmem:[#allocation6 + $0x238] sm:$0xff] }
  0x5d   : > { %445 = vmatpush.msrb.mxu1 %v382_v2  ;;  %351 = vmatmul.f32.vlgmr.msra.gmra.mxu2 %v1258_v47  ;;  %v535_v34 = vld [vmem:[#allocation6 + $0x308] sm:$0xff]  ;;  %v533_v38 = vld [vmem:[#allocation6 + $0x2f8] sm:$0xff]  ;;  %v526_v39 = vld [vmem:[#allocation6 + $0x2c0] sm:$0xff] }
  0x5e   : > { %309 = vmatpush.msra.mxu0 %v238_v3  ;;  %482 = vmatpush.msra.mxu3 %v389_v4  ;;  %v561_v36 = vld.sshfl [vmem:[#allocation1 + $0x8] sm:$0xff pattern:$0x75316420]  ;;  %v524_v42 = vld [vmem:[#allocation6 + $0x2b0] sm:$0xff]  ;;  %v529_v43 = vld [vmem:[#allocation6 + $0x2d8] sm:$0xff] }
  0x5f   : > { %571 = vmatpush.msrb.mxu2 %v544_v5  ;;  %446 = vmatpush.msrb.mxu1 %v380_v6  ;;  %v551_v40 = vld [vmem:[#allocation6 + $0x388] sm:$0x3f]  ;;  %v549_v44 = vld [vmem:[#allocation6 + $0x378] sm:$0xff]  ;;  %v522_v45 = vld [vmem:[#allocation6 + $0x2a0] sm:$0xff] }
  0x60   : > { %840 = vmatmul.msk.f32.vlgmr.msrb.gmra.mxu3 %vm285_vm4, %v1261_v63  ;;  %310 = vmatpush.msra.mxu0 %v236_v9  ;;  %v531_v41 = vld [vmem:[#allocation6 + $0x2e8] sm:$0xff]  ;;  %v520_v48 = vld [vmem:[#allocation6 + $0x290] sm:$0xff]  ;;  %v525_v49 = vld [vmem:[#allocation6 + $0x2b8] sm:$0xff] }
  0x61   : > { %483 = vmatpush.msra.mxu3 %v387_v7  ;;  %572 = vmatpush.msrb.mxu2 %v542_v8  ;;  %v527_v46 = vld [vmem:[#allocation6 + $0x2c8] sm:$0xff]  ;;  %v518_v50 = vld [vmem:[#allocation6 + $0x280] sm:$0xff]  ;;  %v516_v52 = vld [vmem:[#allocation6 + $0x270] sm:$0xff] }
  0x62   : > { %447 = vmatpush.msrb.mxu1 %v378_v10  ;;  %611 = vmatpush.msrb.mxu0 %v545_v13  ;;  %v523_v51 = vld [vmem:[#allocation6 + $0x2a8] sm:$0xff]  ;;  %v521_v53 = vld [vmem:[#allocation6 + $0x298] sm:$0xff]  ;;  %v514_v54 = vld [vmem:[#allocation6 + $0x260] sm:$0xff] }
  0x63   : > { %484 = vmatpush.msra.mxu3 %v385_v11  ;;  %573 = vmatpush.msrb.mxu2 %v540_v12  ;;  %v519_v55 = vld [vmem:[#allocation6 + $0x288] sm:$0xff]  ;;  %v560_v56 = vld.sshfl [vmem:[#allocation1] sm:$0xff pattern:$0x75316420]  ;;  %v517_v57 = vld [vmem:[#allocation6 + $0x278] sm:$0xff] }
  0x64   : > { %448 = vmatpush.msrb.mxu1 %v376_v14  ;;  %612 = vmatpush.msrb.mxu0 %v543_v17  ;;  %v515_v58 = vld [vmem:[#allocation6 + $0x268] sm:$0xff]  ;;  %v274_v59 = vld [vmem:[#allocation8] sm:$0x3]  ;;  %v415_v12 = vld [vmem:[#allocation8 + $0x2] sm:$0x3] }
  0x65   : > { %485 = vmatpush.msra.mxu3 %v383_v15  ;;  %449 = vmatmul.f32.vlgmr.msrb.gmra.mxu1 %v1263_v0  ;;  %v277_v61 = vperm.slane %v274_v59, 1  ;;  %v233_v7 = vld [vmem:[%s1233_s5] sm:$0xff]  ;;  %v417_v15 = vperm.slane %v415_v12, 0 }
  0x66   : > { %574 = vmatpush.msrb.mxu2 %v538_v16  ;;  %311 = vmatmul.f32.vlgmr.msra.gmra.mxu0 %v1258_v47  ;;  %v547_v47 = vld [vmem:[#allocation6 + $0x368] sm:$0xff]  ;;  %v418_v16 = vperm.slane %v415_v12, 1 }
  0x67   : > { %486 = vmatpush.msra.mxu3 %v381_v18  ;;  %613 = vmatpush.msrb.mxu0 %v541_v21 }
  0x68   : > { %575 = vmatpush.msrb.mxu2 %v536_v19  ;;  %843 = vmatpush.msk.msra.mxu1 %vm288_vm3, %v550_v23 }
  0x69   : > { %487 = vmatpush.msra.mxu3 %v379_v22  ;;  %614 = vmatpush.msrb.mxu0 %v539_v25 }
  0x6a   : > { %576 = vmatpush.msrb.mxu2 %v534_v24  ;;  %605 = vmatpush.msra.mxu1 %v548_v27 }
  0x6b   : > { %488 = vmatpush.msra.mxu3 %v377_v26  ;;  %615 = vmatpush.msrb.mxu0 %v537_v30  ;;  %v234_v26 = vld [vmem:[%s1233_s5 + $0x8] sm:$0xff] }
  0x6c   : > { %489 = vmatmul.f32.vlgmr.msra.gmra.mxu3 %v1263_v0  ;;  %577 = vmatpush.msrb.mxu2 %v532_v28  ;;  %v553_v28 = vld [vmem:[#allocation8 + $0x4] sm:$0x3] }
  0x6d   : > { %841 = vmatpush.msk.msrb.mxu3 %vm288_vm3, %v413_v29  ;;  %606 = vmatpush.msra.mxu1 %v546_v32  ;;  %v556_v32 = vperm.slane %v553_v28, 1 }
  0x6e   : > { %578 = vmatpush.msrb.mxu2 %v530_v31  ;;  %616 = vmatpush.msrb.mxu0 %v535_v34 }
  0x6f   : > { %507 = vmatpush.msrb.mxu3 %v411_v33  ;;  %844 = vmatmul.msk.f32.vlgmr.msra.gmra.mxu1 %vm285_vm4, %v561_v36 }
  0x70   : > { %579 = vmatpush.msrb.mxu2 %v528_v35  ;;  %617 = vmatpush.msrb.mxu0 %v533_v38  ;;  %v555_v35 = vperm.slane %v553_v28, 0 }
  0x71   : > { %508 = vmatpush.msrb.mxu3 %v409_v37  ;;  %845 = vmatpush.msk.msrb.mxu1 %vm288_vm3, %v551_v40 }
  0x72   : > { %580 = vmatpush.msrb.mxu2 %v526_v39  ;;  %618 = vmatpush.msrb.mxu0 %v531_v41 }
  0x73   : > { %645 = vmatpush.msrb.mxu1 %v549_v44 }
  0x74   : > { %842 = vmatmul.msk.f32.vlgmr.msrb.gmra.mxu3 %vm285_vm4, %v1261_v63  ;;  %581 = vmatpush.msrb.mxu2 %v524_v42  ;;  %v276_v63 = vperm.slane %v274_v59, 0 }
  0x75   : > { %619 = vmatpush.msrb.mxu0 %v529_v43  ;;  %646 = vmatpush.msrb.mxu1 %v547_v47 }
  0x76   : > { %582 = vmatpush.msrb.mxu2 %v522_v45 }
  0x77   : > { %620 = vmatpush.msrb.mxu0 %v527_v46  ;;  %846 = vmatmul.msk.f32.vlgmr.msrb.gmra.mxu1 %vm285_vm4, %v561_v36 }
  0x78   : > { %583 = vmatpush.msrb.mxu2 %v520_v48 }
  0x79   : > { %621 = vmatpush.msrb.mxu0 %v525_v49 }
  0x7a   : > { %584 = vmatpush.msrb.mxu2 %v518_v50 }
  0x7b   : > { %622 = vmatpush.msrb.mxu0 %v523_v51 }
  0x7c   : > { %585 = vmatpush.msrb.mxu2 %v516_v52 }
  0x7d   : > { %623 = vmatpush.msrb.mxu0 %v521_v53 }
  0x7e   : > { %586 = vmatpush.msrb.mxu2 %v514_v54 }
  0x7f   : > { %624 = vmatpush.msrb.mxu0 %v519_v55  ;;  %587 = vmatmul.f32.vlgmr.msrb.gmra.mxu2 %v560_v56 }
  0x81   : > { %625 = vmatpush.msrb.mxu0 %v517_v57 }
  0x83   : > { %626 = vmatpush.msrb.mxu0 %v515_v58 }
  0x84   : > { %627 = vmatmul.f32.vlgmr.msrb.gmra.mxu0 %v560_v56  ;;  %v235_v56 = vld [vmem:[%s1233_s5 + $0x10] sm:$0xff] }
  0xce   : > { %v372_v60 = vpop.f32.mrf.mxu3 }
  0xd8   : > { %v332_v3 = vpop.f32.mrf.mxu1 }
  0xe0   : > { %v352_v62 = vpop.f32.mrf.mxu2 }
  0xe1   : > { %v353_v0 = vadd.f32 %v352_v62, %v277_v61 }
  0xe2   : > { %v450_v13 = vpop.f32.mrf.mxu1 }
  0xe3   : > { %v373_v1 = vadd.f32 %v372_v60, %v353_v0  ;;  %v312_v2 = vpop.f32.mrf.mxu0  ;;  %v470_v5 = vpop.f32.mrf.mxu3  ;;  %v451_v19 = vadd.f32 %v450_v13, %v417_v15 }
  0xe4   : > { %v313_v4 = vadd.f32 %v312_v2, %v276_v63 }
  0xe5   : > { %v653_v6 = vrot.slane %v373_v1, 4  ;;  %v471_v25 = vadd.f32 %v470_v5, %v451_v19 }
  0xe6   : > { %v333_v8 = vadd.f32 %v332_v3, %v313_v4 }
  0xe8   : > { %v655_v9 = vsel %vm654_vm5, %v333_v8, %v653_v6 }
  0xe9   : > { %v657_v10 = vadd.f32 %v655_v9, %v233_v7 }
  0xeb   : > { %v847_v11 = vmul.f32 -1.442695, %v657_v10 }
  0xec   : > { %v608_v23 = vpop.f32.mrf.mxu1 }
  0xed   : > { %932 = vpow2.f32 %v847_v11 }
  0xef   : > { %v490_v14 = vpop.f32.mrf.mxu3 }
  0xf0   : > { %v491_v21 = vadd.f32 %v490_v14, %v418_v16 }
  0xf3   : > { %v933_v17 = vpop.eup %932 }
  0xf4   : > { %v661_v18 = vadd.f32 1.0, %v933_v17  ;;  %v648_v38 = vpop.f32.mrf.mxu1 }
  0xf6   : > { %934 = vrcp.f32 %v661_v18  ;;  %v673_v45 = vand.u32 2147483648, %v661_v18  ;;  %vm667_vm7 = vweird.f32 %v661_v18  ;;  %v671_v46 = vand.u32 2147483647, %v661_v18 }
  0xf7   : > { %v510_v22 = vpop.f32.mrf.mxu3 }
  0xf8   : > { %v511_v24 = vadd.f32 %v510_v22, %v491_v21  ;;  %v674_v52 = vor.u32 1.1754944e-38, %v673_v45  ;;  %vm672_vm9 = vcmp.eq.f32.partialorder %v671_v46, 8.507059e+37 }
  0xfa   : > { %v679_v27 = vrot.slane %v511_v24, 4 }
  0xfc   : > { %v680_v29 = vsel %vm654_vm5, %v471_v25, %v679_v27  ;;  %v935_v30 = vpop.eup %934 }
  0xfd   : > { %v682_v31 = vadd.f32 %v680_v29, %v234_v26  ;;  %v663_v33 = vmul.f32 %v935_v30, %v661_v18  ;;  %vm668_vm6 = vweird.f32 %v935_v30 }
  0xfe   : > { %vm669_vm8 = vmor %vm667_vm7, %vm668_vm6 }
  0xff   : > { %v848_v34 = vmul.f32 -1.442695, %v682_v31  ;;  %v664_v36 = vsub.f32 1.0, %v663_v33 }
 0x101   : > { %936 = vpow2.f32 %v848_v34  ;;  %v628_v37 = vpop.f32.mrf.mxu0  ;;  %v665_v41 = vmul.f32 %v935_v30, %v664_v36 }
 0x102   : > { %v629_v39 = vadd.f32 %v628_v37, %v556_v32  ;;  %v588_v40 = vpop.f32.mrf.mxu2 }
 0x103   : > { %v589_v42 = vadd.f32 %v588_v40, %v555_v35  ;;  %v666_v44 = vadd.f32 %v935_v30, %v665_v41 }
 0x104   : > { %v649_v43 = vadd.f32 %v648_v38, %v629_v39 }
 0x105   : > { %v609_v48 = vadd.f32 %v608_v23, %v589_v42  ;;  %v670_v51 = vsel %vm669_vm8, %v935_v30, %v666_v44 }
 0x106   : > { %v704_v49 = vrot.slane %v649_v43, 4  ;;  %v675_v53 = vsel %vm672_vm9, %v674_v52, %v670_v51 }
 0x107   : > { %v937_v47 = vpop.eup %936 }
 0x108   : > { %v686_v50 = vadd.f32 1.0, %v937_v47  ;;  %v705_v54 = vsel %vm654_vm5, %v609_v48, %v704_v49 }
 0x109   : > { %v707_v55 = vmul.f32 %v705_v54, %v675_v53 }
 0x10a   : > { %938 = vrcp.f32 %v686_v50  ;;  %v698_v61 = vand.u32 2147483648, %v686_v50  ;;  %v696_v63 = vand.u32 2147483647, %v686_v50  ;;  %vm692_vm11 = vweird.f32 %v686_v50 }
 0x10b   : > { %v708_v59 = vadd.f32 %v707_v55, %v235_v56 }
 0x10c   : > { %v699_v1 = vor.u32 1.1754944e-38, %v698_v61  ;;  %vm697_vm13 = vcmp.eq.f32.partialorder %v696_v63, 8.507059e+37 }
 0x10d   : > { %940 = vtanh.f32 %v708_v59 }
 0x110   : > { %v939_v57 = vpop.eup %938 }
 0x111   : > { %v688_v58 = vmul.f32 %v939_v57, %v686_v50  ;;  %vm693_vm10 = vweird.f32 %v939_v57 }
 0x112   : > { %vm694_vm12 = vmor %vm692_vm11, %vm693_vm10 }
 0x113   : > { %v689_v60 = vsub.f32 1.0, %v688_v58  ;;  %v941_v5 = vpop.eup %940 }
 0x115   : > { %v690_v62 = vmul.f32 %v939_v57, %v689_v60 }
 0x117   : > { %v691_v0 = vadd.f32 %v939_v57, %v690_v62 }
 0x119   : > { %v695_v2 = vsel %vm694_vm12, %v939_v57, %v691_v0 }
 0x11a   : > { %v700_v3 = vsel %vm697_vm13, %v699_v1, %v695_v2 }
 0x11b   : > { %v710_v4 = vsub.f32 1.0, %v700_v3  ;;  %v712_v7 = vmul.f32 %v700_v3, %v1251_v20 }
 0x11d   : > { %v711_v6 = vmul.f32 %v941_v5, %v710_v4 }
 0x11f   : > { %v713_v8 = vadd.f32 %v712_v7, %v711_v6 }
 0x121   : > { %716 = vst.msk [vmem:[#allocation2] sm:$0xff] %vm715_vm15, %v713_v8 }
 0x122   : > { %717 = vst.msk [vmem:[%s1244_s24] sm:$0xff] %vm715_vm15, %v713_v8 }
 0x123   : > { %1059 = shalt.err (!%p1056_p12)
}
 0x124   : > { %868 = dma.vmem_to_hbm [thread:$0]  (%p1202_p5), %s733_s6, 128, %s735_s16, %s719_s7  }
 0x125 PF: > { %p890_p13 = scmp.ge.s32.totalorder %s1102_s15, 2  ;;  %s746_s26 = sand.u32 1, %s1090_s12  }
 0x126   : > { %s747_s28 = scalar_lea.sflag [#allocation5], %s746_s26 }
 0x127   : > { %p882_p0 = pnand %p890_p13, %p1168_p6 }
 0x129   : > { %p883_p3 = pneg %p882_p0 }
 0x12b   : > { %1085 = dma.done.wait (%p883_p3), %s747_s28, 128  }
 0x12c   : > { %1087 = vsyncadd (%p883_p3), %s747_s28, 4294967168  ;;  %p17_p7 = scmp.ge.s32.totalorder %s1189_s8, 10   ;;  %s1333_s12 = smov %s1094_s13 }
 0x12d   : > { %s1334_s13 = smov %s1098_s14  ;;  %s1335_s14 = smov %s1198_s11 }
 0x12e   : > { %s1336_s15 = smov %s1189_s8  ;;  %19 = sbr.rel (!%p17_p7) target bundleno = 6 (0x6), region = 93 }
 0x133   :  { %753 = vsyncpa [#allocation4], 1 }
 0x134   :  { %755 = vsyncpa [#allocation4 + $0x1], 1 }
 0x135   :  { %756 = vsyncpa [#allocation7], 1 }
 0x136   :  { %757 = vsyncpa [#allocation5], 1 }
 0x137   :  { %759 = vsyncpa [#allocation5 + $0x1], 1 }

</bundles_post_ra>
